<compile_context>
chip_gen: v7x
topology: tpu7x:2x2x1
jax: 0.10.0
libtpu: 0.0.40
codegen_flags: <defaults>
</compile_context>

<pallas_src>
import functools

import jax
import jax.numpy as jnp
from jax.experimental import pallas as pl
from jax.experimental.pallas import tpu as pltpu


def attention_kernel(x_ref, wq_ref, wk_ref, wv_ref, wp_ref, bp_ref, o_ref, *,
                     num_heads, scale, compute_dtype):
    """block_b batch elements per grid step.

    x_ref              : (Bt, N, C)   current batch slab
    wq/wk/wv_ref       : (C, C)       resident in VMEM (constant index_map), pre-cast
    wp_ref             : (C, C)       resident in VMEM, pre-cast
    bp_ref             : (1, C)       f32
    o_ref              : (Bt, N, C)
    """
    Bt, N, C = x_ref.shape
    hd = C // num_heads
    R = Bt * N              # rows handled this grid step (matmul M dim)
    G = Bt * num_heads      # attention batch = (batch, head) pairs

    # (Bt, N, C) -> (R, C): merge leading dims, last dim unchanged (cheap, lane-dense view)
    x = x_ref[...].reshape(R, C).astype(compute_dtype)

    # Weight-split projections (one MXU matmul each, f32 accumulation).
    q = jnp.dot(x, wq_ref[...], preferred_element_type=jnp.float32)   # (R, C)
    k = jnp.dot(x, wk_ref[...], preferred_element_type=jnp.float32)   # (R, C)
    v = jnp.dot(x, wv_ref[...], preferred_element_type=jnp.float32)   # (R, C)

    def split_heads(t):  # (R, C) -> (G, N, hd), heads folded into the batch dim
        t = t.reshape(Bt, N, num_heads, hd)
        t = jnp.transpose(t, (0, 2, 1, 3))            # (Bt, H, N, hd)
        return t.reshape(G, N, hd)

    qh = split_heads(q).astype(compute_dtype)
    kh = split_heads(k).astype(compute_dtype)
    vh = split_heads(v).astype(compute_dtype)

    # Scores: one batched MXU op over all (batch, head) pairs.
    s = jnp.einsum('gnd,gmd->gnm', qh, kh,
                   preferred_element_type=jnp.float32) * scale        # (G, N, N), f32

    # Numerically-stable softmax over the key axis — exact divide (no approx reciprocal).
    m = jnp.max(s, axis=-1, keepdims=True)
    p = jnp.exp(s - m)
    p = p / jnp.sum(p, axis=-1, keepdims=True)                        # f32

    # attn @ v: second batched MXU op.
    ctx = jnp.einsum('gnm,gmd->gnd', p.astype(compute_dtype), vh,
                     preferred_element_type=jnp.float32)              # (G, N, hd)

    # Merge heads back == .transpose(1, 2).reshape(B, N, C) in the PyTorch module.
    ctx = ctx.reshape(Bt, num_heads, N, hd)
    ctx = jnp.transpose(ctx, (0, 2, 1, 3)).reshape(R, C)

    out = jnp.dot(ctx.astype(compute_dtype), wp_ref[...],
                  preferred_element_type=jnp.float32) + bp_ref[...]   # proj (+ bias, f32)
    o_ref[...] = out.reshape(Bt, N, C).astype(o_ref.dtype)


def _pick_block_b(B, N, target_rows=256):
    """Largest divisor of B with block_b*N near the MXU-sized target, but keep >= 2 grid
    steps when B allows so v7x's two TensorCores both get work."""
    want = max(1, target_rows // max(N, 1))
    divisors = [d for d in range(1, B + 1) if B % d == 0]
    cand = [d for d in divisors if d <= want]
    bt = max(cand) if cand else 1
    if B // bt < 2 and B >= 2:
        cand2 = [d for d in divisors if B // d >= 2]
        if cand2:
            bt = max(cand2)
    return bt


def attention(x, wqkv, wp, bp, *, num_heads=4, qk_scale=None,
              compute_dtype=jnp.float32, block_b=None):
    """x: (B, N, C); wqkv: (C, 3C); wp: (C, C); bp: (1, C) or (C,)."""
    B, N, C = x.shape
    hd = C // num_heads
    scale = qk_scale if qk_scale is not None else hd ** (-0.5)

    if block_b is None:
        block_b = _pick_block_b(B, N)
    assert B % block_b == 0, (B, block_b)
    grid_b = B // block_b

    # Split + pre-cast weights once in XLA (not per grid step in the kernel).
    wq = wqkv[:, :C].astype(compute_dtype)
    wk = wqkv[:, C:2 * C].astype(compute_dtype)
    wv = wqkv[:, 2 * C:].astype(compute_dtype)
    wp_c = wp.astype(compute_dtype)
    bp_f = jnp.asarray(bp, dtype=jnp.float32).reshape(1, C)

    kernel = functools.partial(attention_kernel, num_heads=num_heads,
                               scale=scale, compute_dtype=compute_dtype)

    # Advisory cost estimate for XLA scheduling.
    flops_per_b = (2 * N * C * 3 * C            # q/k/v projections
                   + num_heads * 4 * N * N * hd  # q@k^T and attn@v per head
                   + 2 * N * C * C)              # output projection
    wbytes = jnp.dtype(compute_dtype).itemsize
    cost = pl.CostEstimate(
        flops=B * flops_per_b,
        transcendentals=B * num_heads * N * N,   # exp in softmax
        bytes_accessed=(x.size * x.dtype.itemsize
                        + (wq.size + wk.size + wv.size + wp_c.size) * wbytes
                        + bp_f.size * 4
                        + B * N * C * 4),
    )

    grid_spec = pltpu.PrefetchScalarGridSpec(
        num_scalar_prefetch=0,
        grid=(grid_b,),
        in_specs=[
            pl.BlockSpec((block_b, N, C), lambda b: (b, 0, 0)),  # batch slab per step
            pl.BlockSpec((C, C), lambda b: (0, 0)),              # weights: constant index
            pl.BlockSpec((C, C), lambda b: (0, 0)),              #   -> resident in VMEM
            pl.BlockSpec((C, C), lambda b: (0, 0)),
            pl.BlockSpec((C, C), lambda b: (0, 0)),
            pl.BlockSpec((1, C), lambda b: (0, 0)),
        ],
        out_specs=pl.BlockSpec((block_b, N, C), lambda b: (b, 0, 0)),
    )

    return pl.pallas_call(
        kernel,
        out_shape=jax.ShapeDtypeStruct((B, N, C), jnp.float32),
        grid_spec=grid_spec,
        compiler_params=pltpu.CompilerParams(
            dimension_semantics=("parallel",),   # megacore: batch sharded across TCs on v7x
        ),
        cost_estimate=cost,
    )(x, wq, wk, wv, wp_c, bp_f)


def reference(x, wqkv, wp, bp, num_heads):
    B, N, C = x.shape
    hd = C // num_heads
    scale = hd ** (-0.5)
    qkv = (x @ wqkv).reshape(B, N, 3, num_heads, hd).transpose(2, 0, 3, 1, 4)
    q, k, v = qkv[0], qkv[1], qkv[2]
    attn = jnp.einsum('bhnd,bhmd->bhnm', q, k) * scale
    attn = jax.nn.softmax(attn, axis=-1)
    out = jnp.einsum('bhnm,bhmd->bhnd', attn, v)
    out = out.transpose(0, 2, 1, 3).reshape(B, N, C)
    return out @ wp + bp


if __name__ == "__main__":
    # Small shapes consistent with the module: dim=32, num_heads=4 (head_dim=8), seq=8, batch=2
    B, N, C, num_heads = 2, 8, 32, 4

    key = jax.random.PRNGKey(0)
    kx, kqkv, kp, kb = jax.random.split(key, 4)

    x = jax.random.normal(kx, (B, N, C), dtype=jnp.float32)
    # PyTorch nn.Linear weight is (out, in); stored here pre-transposed as (in, out).
    wqkv = jax.random.normal(kqkv, (C, 3 * C), dtype=jnp.float32) * (C ** -0.5)  # qkv_bias=False
    wp = jax.random.normal(kp, (C, C), dtype=jnp.float32) * (C ** -0.5)
    bp = jax.random.normal(kb, (1, C), dtype=jnp.float32) * 0.1

    out = attention(x, wqkv, wp, bp, num_heads=num_heads)
    jax.block_until_ready(out)

    ref = reference(x, wqkv, wp, bp, num_heads)
    assert out.shape == (B, N, C)
    # f32 compute + exact softmax divide -> errors at float32 rounding level
    assert jnp.allclose(out, ref, atol=1e-4, rtol=1e-4), float(jnp.max(jnp.abs(out - ref)))

    print("KERNEL_OK")
</pallas_src>

<mosaic_0001>
module attributes {stable_mosaic.version = 11 : i64} {
  func.func @attention_kernel(%arg0: i32, %arg1: memref<1x8x32xf32, #tpu.memory_space<vmem>>, %arg2: memref<32x32xf32, #tpu.memory_space<vmem>>, %arg3: memref<32x32xf32, #tpu.memory_space<vmem>>, %arg4: memref<32x32xf32, #tpu.memory_space<vmem>>, %arg5: memref<32x32xf32, #tpu.memory_space<vmem>>, %arg6: memref<1x32xf32, #tpu.memory_space<vmem>>, %arg7: memref<1x8x32xf32, #tpu.memory_space<vmem>>) attributes {dimension_semantics = [#tpu.dimension_semantics<parallel>], iteration_bounds = array<i64: 2>, scalar_prefetch = 0 : i64, scratch_operands = 0 : i64, tpu.core_type = #tpu.core_type<tc>, window_params = [{transform_indices = @transform_0, window_bounds = array<i64: 1, 8, 32>}, {pipeline_mode = #tpu.pipeline_mode<synchronous>, transform_indices = @transform_1, window_bounds = array<i64: 32, 32>}, {pipeline_mode = #tpu.pipeline_mode<synchronous>, transform_indices = @transform_2, window_bounds = array<i64: 32, 32>}, {pipeline_mode = #tpu.pipeline_mode<synchronous>, transform_indices = @transform_3, window_bounds = array<i64: 32, 32>}, {pipeline_mode = #tpu.pipeline_mode<synchronous>, transform_indices = @transform_4, window_bounds = array<i64: 32, 32>}, {pipeline_mode = #tpu.pipeline_mode<synchronous>, transform_indices = @transform_5, window_bounds = array<i64: 1, 32>}, {transform_indices = @transform_6, window_bounds = array<i64: 1, 8, 32>}]} {
    %c0 = arith.constant 0 : index
    %c0_0 = arith.constant 0 : index
    %c0_1 = arith.constant 0 : index
    %0 = vector.load %arg1[%c0, %c0_0, %c0_1] : memref<1x8x32xf32, #tpu.memory_space<vmem>>, vector<1x8x32xf32>
    %1 = vector.shape_cast %0 : vector<1x8x32xf32> to vector<8x32xf32>
    %c0_2 = arith.constant 0 : index
    %c0_3 = arith.constant 0 : index
    %2 = vector.load %arg2[%c0_2, %c0_3] : memref<32x32xf32, #tpu.memory_space<vmem>>, vector<32x32xf32>
    %cst = arith.constant dense<0.000000e+00> : vector<8x32xf32>
    %3 = tpu.matmul %1, %2, %cst {dimension_numbers = #tpu.dot_dimension_numbers<[1], [0], [0], [1], [0, 0, 1, 1], [], []>} : vector<8x32xf32>, vector<32x32xf32>, vector<8x32xf32> -> vector<8x32xf32>
    %c0_4 = arith.constant 0 : index
    %c0_5 = arith.constant 0 : index
    %4 = vector.load %arg3[%c0_4, %c0_5] : memref<32x32xf32, #tpu.memory_space<vmem>>, vector<32x32xf32>
    %cst_6 = arith.constant dense<0.000000e+00> : vector<8x32xf32>
    %5 = tpu.matmul %1, %4, %cst_6 {dimension_numbers = #tpu.dot_dimension_numbers<[1], [0], [0], [1], [0, 0, 1, 1], [], []>} : vector<8x32xf32>, vector<32x32xf32>, vector<8x32xf32> -> vector<8x32xf32>
    %c0_7 = arith.constant 0 : index
    %c0_8 = arith.constant 0 : index
    %6 = vector.load %arg4[%c0_7, %c0_8] : memref<32x32xf32, #tpu.memory_space<vmem>>, vector<32x32xf32>
    %cst_9 = arith.constant dense<0.000000e+00> : vector<8x32xf32>
    %7 = tpu.matmul %1, %6, %cst_9 {dimension_numbers = #tpu.dot_dimension_numbers<[1], [0], [0], [1], [0, 0, 1, 1], [], []>} : vector<8x32xf32>, vector<32x32xf32>, vector<8x32xf32> -> vector<8x32xf32>
    %8 = vector.shape_cast %3 : vector<8x32xf32> to vector<1x8x4x8xf32>
    %9 = tpu.transpose %8, [0, 2, 1, 3] : vector<1x8x4x8xf32> -> vector<1x4x8x8xf32>
    %10 = vector.shape_cast %9 : vector<1x4x8x8xf32> to vector<4x8x8xf32>
    %11 = vector.shape_cast %5 : vector<8x32xf32> to vector<1x8x4x8xf32>
    %12 = tpu.transpose %11, [0, 2, 1, 3] : vector<1x8x4x8xf32> -> vector<1x4x8x8xf32>
    %13 = vector.shape_cast %12 : vector<1x4x8x8xf32> to vector<4x8x8xf32>
    %14 = vector.shape_cast %7 : vector<8x32xf32> to vector<1x8x4x8xf32>
    %15 = tpu.transpose %14, [0, 2, 1, 3] : vector<1x8x4x8xf32> -> vector<1x4x8x8xf32>
    %16 = vector.shape_cast %15 : vector<1x4x8x8xf32> to vector<4x8x8xf32>
    "tpu.trace_start"() <{level = 10 : i32, message = "gnd,gmd->gnm"}> : () -> ()
    %cst_10 = arith.constant dense<0.000000e+00> : vector<4x8x8xf32>
    %17 = tpu.matmul %10, %13, %cst_10 {dimension_numbers = #tpu.dot_dimension_numbers<[2], [2], [1], [1], [0, 0, 0, 1, 1, 1], [0], [0]>} : vector<4x8x8xf32>, vector<4x8x8xf32>, vector<4x8x8xf32> -> vector<4x8x8xf32>
    "tpu.trace_stop"() : () -> ()
    %cst_11 = arith.constant 0.353553385 : f32
    %18 = vector.broadcast %cst_11 : f32 to vector<4x8x8xf32>
    %19 = arith.mulf %17, %18 : vector<4x8x8xf32>
    %cst_12 = arith.constant dense<0xFF800000> : vector<4x8xf32>
    %20 = vector.multi_reduction <maximumf>, %19, %cst_12 [2] : vector<4x8x8xf32> to vector<4x8xf32>
    %21 = vector.shape_cast %20 : vector<4x8xf32> to vector<4x8x1xf32>
    %22 = vector.broadcast %21 : vector<4x8x1xf32> to vector<4x8x8xf32>
    %23 = arith.subf %19, %22 : vector<4x8x8xf32>
    %24 = math.exp %23 : vector<4x8x8xf32>
    %cst_13 = arith.constant dense<0.000000e+00> : vector<4x8xf32>
    %25 = vector.multi_reduction <add>, %24, %cst_13 [2] : vector<4x8x8xf32> to vector<4x8xf32>
    %26 = vector.shape_cast %25 : vector<4x8xf32> to vector<4x8x1xf32>
    %27 = vector.broadcast %26 : vector<4x8x1xf32> to vector<4x8x8xf32>
    %28 = arith.divf %24, %27 : vector<4x8x8xf32>
    "tpu.trace_start"() <{level = 10 : i32, message = "gnm,gmd->gnd"}> : () -> ()
    %cst_14 = arith.constant dense<0.000000e+00> : vector<4x8x8xf32>
    %29 = tpu.matmul %28, %16, %cst_14 {dimension_numbers = #tpu.dot_dimension_numbers<[2], [1], [1], [2], [0, 0, 0, 1, 1, 2], [0], [0]>} : vector<4x8x8xf32>, vector<4x8x8xf32>, vector<4x8x8xf32> -> vector<4x8x8xf32>
    "tpu.trace_stop"() : () -> ()
    %30 = vector.shape_cast %29 : vector<4x8x8xf32> to vector<1x4x8x8xf32>
    %31 = tpu.transpose %30, [0, 2, 1, 3] : vector<1x4x8x8xf32> -> vector<1x8x4x8xf32>
    %32 = vector.shape_cast %31 : vector<1x8x4x8xf32> to vector<8x32xf32>
    %c0_15 = arith.constant 0 : index
    %c0_16 = arith.constant 0 : index
    %33 = vector.load %arg5[%c0_15, %c0_16] : memref<32x32xf32, #tpu.memory_space<vmem>>, vector<32x32xf32>
    %cst_17 = arith.constant dense<0.000000e+00> : vector<8x32xf32>
    %34 = tpu.matmul %32, %33, %cst_17 {dimension_numbers = #tpu.dot_dimension_numbers<[1], [0], [0], [1], [0, 0, 1, 1], [], []>} : vector<8x32xf32>, vector<32x32xf32>, vector<8x32xf32> -> vector<8x32xf32>
    %c0_18 = arith.constant 0 : index
    %c0_19 = arith.constant 0 : index
    %35 = vector.load %arg6[%c0_18, %c0_19] : memref<1x32xf32, #tpu.memory_space<vmem>>, vector<1x32xf32>
    %36 = vector.broadcast %35 : vector<1x32xf32> to vector<8x32xf32>
    %37 = arith.addf %34, %36 : vector<8x32xf32>
    %38 = vector.shape_cast %37 : vector<8x32xf32> to vector<1x8x32xf32>
    %c0_20 = arith.constant 0 : index
    %c0_21 = arith.constant 0 : index
    %c0_22 = arith.constant 0 : index
    %39 = vector.load %arg7[%c0_20, %c0_21, %c0_22] : memref<1x8x32xf32, #tpu.memory_space<vmem>>, vector<1x8x32xf32>
    tpu.vector_store %arg7[%c0_20, %c0_21, %c0_22], %38 {strides = array<i32>} : memref<1x8x32xf32, #tpu.memory_space<vmem>>, vector<1x8x32xf32>,
    return
  }
  func.func @transform_0(%arg0: i32) -> (i32, i32, i32) {
    %c0_i32 = arith.constant 0 : i32
    %c0_i32_0 = arith.constant 0 : i32
    %c0_i32_1 = arith.constant 0 : i32
    return %arg0, %c0_i32, %c0_i32_0 : i32, i32, i32
  }
  func.func @transform_1(%arg0: i32) -> (i32, i32) {
    %c0_i32 = arith.constant 0 : i32
    %c0_i32_0 = arith.constant 0 : i32
    %c0_i32_1 = arith.constant 0 : i32
    return %c0_i32, %c0_i32_0 : i32, i32
  }
  func.func @transform_2(%arg0: i32) -> (i32, i32) {
    %c0_i32 = arith.constant 0 : i32
    %c0_i32_0 = arith.constant 0 : i32
    %c0_i32_1 = arith.constant 0 : i32
    return %c0_i32, %c0_i32_0 : i32, i32
  }
  func.func @transform_3(%arg0: i32) -> (i32, i32) {
    %c0_i32 = arith.constant 0 : i32
    %c0_i32_0 = arith.constant 0 : i32
    %c0_i32_1 = arith.constant 0 : i32
    return %c0_i32, %c0_i32_0 : i32, i32
  }
  func.func @transform_4(%arg0: i32) -> (i32, i32) {
    %c0_i32 = arith.constant 0 : i32
    %c0_i32_0 = arith.constant 0 : i32
    %c0_i32_1 = arith.constant 0 : i32
    return %c0_i32, %c0_i32_0 : i32, i32
  }
  func.func @transform_5(%arg0: i32) -> (i32, i32) {
    %c0_i32 = arith.constant 0 : i32
    %c0_i32_0 = arith.constant 0 : i32
    %c0_i32_1 = arith.constant 0 : i32
    return %c0_i32, %c0_i32_0 : i32, i32
  }
  func.func @transform_6(%arg0: i32) -> (i32, i32, i32) {
    %c0_i32 = arith.constant 0 : i32
    %c0_i32_0 = arith.constant 0 : i32
    %c0_i32_1 = arith.constant 0 : i32
    return %arg0, %c0_i32, %c0_i32_0 : i32, i32, i32
  }
}

</mosaic_0001>

<bundles_post_ra>
// kernel: tpu_custom_call.1
= control target key start
LH: loop header
LB: loop body
LE: loop exit
PB: predicated region body
PF: predicated region fallthrough
CT: control target
= control target key end

     0   :  { %11 = vsyncpa [#allocation3], 0  ;;  %s3036_s0 = inlined_call_operand.hbm [shape: f32[2,8,32], index: 0, kind: input, shape index: {}]   ;;  %s3037_s1 = inlined_call_operand.hbm [shape: f32[32,32], index: 1, kind: input, shape index: {}]   ;;  %s3038_s2 = inlined_call_operand.hbm [shape: f32[32,32], index: 2, kind: input, shape index: {}]   ;;  %s3039_s3 = inlined_call_operand.hbm [shape: f32[32,32], index: 3, kind: input, shape index: {}]   ;;  %s3040_s4 = inlined_call_operand.hbm [shape: f32[32,32], index: 4, kind: input, shape index: {}]   ;;  %s3041_s5 = inlined_call_operand.vmem [shape: f32[1,32], index: 5, kind: input, shape index: {}]   ;;  %s3042_s6 = inlined_call_operand.hbm [shape: f32[2,8,32], index: 6, kind: output, shape index: {}]  }
   0x1   :  { %13 = vsyncpa [#allocation3 + $0x1], 0 }
   0x2   :  { %14 = vsyncpa [#allocation6], 0 }
   0x3   :  { %15 = vsyncpa [#allocation9], 0 }
   0x4   :  { %16 = vsyncpa [#allocation4], 0 }
   0x5   :  { %18 = vsyncpa [#allocation4 + $0x1], 0  ;;  %s2572_s21 = smov 0   ;;  %s2574_s22 = smov 0  }
   0x6   :  { %s2576_s23 = smov 0   ;;  %s2578_s24 = smov 0  }
   0x7 LB: > { %s2518_s25 = smov [#allocation5]   ;;  %s2593_s27 = sadd.s32 4294967295, %s2516_s24   ;;  %s2516_s24 = sphi %s2578_s24, %s3066_s24   ;;  %s2512_s23 = sphi %s2576_s23, %s3065_s23   ;;  %s2508_s22 = sphi %s2574_s22, %s3064_s22   ;;  %s2504_s21 = sphi %s2572_s21, %s3063_s21  }
   0x8   : > { %s198_s26 = sshll.u32 %s2518_s25, 4  ;;  %p1996_p0 = scmp.ge.s32.totalorder %s2516_s24, 1  ;;  %s2598_s26 = int_to_ptr.vmem [resolvable:$true] %s198_s26 }
   0x9   : > { %p3043_p1 = scmp.eq.s32.totalorder %s2593_s27, 0  ;;  %p186_p2 = scmp.lt.s32.totalorder %s2516_s24, 3 }
   0xa   : > { %s2519_s29 = smov [#allocation8]   ;;  %s2520_s8 = smov [#allocation7]  }
   0xb   : > { %p2600_p3 = pnand %p1996_p0, %p186_p2  ;;  %s224_s30 = sshll.u32 %s2519_s29, 4  ;;  %s2613_s30 = int_to_ptr.vmem [resolvable:$true] %s224_s30 }
   0xc   : > { %s211_s9 = sshll.u32 %s2520_s8, 4  ;;  %s2300_s12 = scalar_lea.hbm %s3037_s1, 512  ;;  %s2615_s9 = int_to_ptr.vmem [resolvable:$true] %s211_s9 }
   0xd   : > { %s3046_s28 = scalar_select %p2600_p3, 1, 0 }
   0xe   : > { %p2204_p5 = pneg %p2600_p3  ;;  %p2301_p7 = scmp.ne.s32.totalorder %s3037_s1, %s2300_s12 }
   0xf   : > { %p2307_p11 = scmp.lt.u32.totalorder %s2300_s12, %s3037_s1 }
  0x10   : > { %p2609_p6 = pnand %p2204_p5, %p3043_p1 }
  0x12   : > { %p2625_p8 = pneg %p2609_p6 }
  0x14   : > { %p2303_p9 = pnand %p2625_p8, %p2301_p7 }
  0x16   : > { %p2304_p10 = pneg %p2303_p9 }
  0x18   : > { %p2309_p12 = pnand %p2307_p11, %p2304_p10 }
  0x1a   : > { %2312 = shalt.err (!%p2309_p12)
}
  0x1b   : > { %s2313_s18 = scalar_lea.vmem %s2598_s26, 512  ;;  %p2321_p5 = scmp.lt.s32.totalorder %s2598_s26, %s2598_s26 }
  0x1c   : > { %p2314_p13 = scmp.ne.s32.totalorder %s2598_s26, %s2313_s18  ;;  %p2322_p4 = scmp.lt.s32.totalorder %s2313_s18, %s2313_s18 }
  0x1e   : > { %p2316_p0 = pnand %p2314_p13, %p2625_p8  ;;  %p2323_p7 = por %p2322_p4, %p2321_p5 }
  0x20   : > { %p2317_p2 = pneg %p2316_p0 }
  0x22   : > { %p2324_p9 = pnand %p2323_p7, %p2317_p2 }
  0x24   : > { %2327 = shalt.err (!%p2324_p9)
}
  0x25   : > { %s2521_s19 = smov 128   ;;  %s2522_s20 = smov 8  }
  0x26   : > { %2207 = dma.hbm_to_vmem [thread:$0]  (!%p2609_p6), %s3037_s1, 512, %s2598_s26, [#allocation6], %s2521_s19, %s2521_s19, %s2522_s20  }
  0x27   : > { %s2328_s11 = scalar_lea.hbm %s3039_s3, 512 }
  0x28   : > { %p2329_p4 = scmp.ne.s32.totalorder %s3039_s3, %s2328_s11  ;;  %p2335_p12 = scmp.lt.u32.totalorder %s2328_s11, %s3039_s3 }
  0x2a   : > { %p2331_p10 = pnand %p2329_p4, %p2625_p8 }
  0x2c   : > { %p2332_p11 = pneg %p2331_p10 }
  0x2e   : > { %p2337_p13 = pnand %p2335_p12, %p2332_p11 }
  0x30   : > { %2340 = shalt.err (!%p2337_p13)
}
  0x31   : > { %s2341_s26 = scalar_lea.vmem %s2613_s30, 512  ;;  %p2349_p7 = scmp.lt.s32.totalorder %s2613_s30, %s2613_s30 }
  0x32   : > { %p2342_p0 = scmp.ne.s32.totalorder %s2613_s30, %s2341_s26  ;;  %p2350_p9 = scmp.lt.s32.totalorder %s2341_s26, %s2341_s26 }
  0x34   : > { %p2344_p2 = pnand %p2342_p0, %p2625_p8  ;;  %p2351_p4 = por %p2350_p9, %p2349_p7 }
  0x36   : > { %p2345_p5 = pneg %p2344_p2 }
  0x38   : > { %p2352_p10 = pnand %p2351_p4, %p2345_p5 }
  0x3a   : > { %2355 = shalt.err (!%p2352_p10)
}
  0x3b   : > { %2213 = dma.hbm_to_vmem [thread:$0]  (!%p2609_p6), %s3039_s3, 512, %s2613_s30, [#allocation9], %s2521_s19, %s2521_s19, %s2522_s20  }
  0x3c   : > { %s2356_s8 = scalar_lea.hbm %s3038_s2, 512 }
  0x3d   : > { %p2357_p11 = scmp.ne.s32.totalorder %s3038_s2, %s2356_s8  ;;  %p2363_p0 = scmp.lt.u32.totalorder %s2356_s8, %s3038_s2 }
  0x3f   : > { %p2359_p12 = pnand %p2357_p11, %p2625_p8 }
  0x41   : > { %p2360_p13 = pneg %p2359_p12 }
  0x43   : > { %p2365_p2 = pnand %p2363_p0, %p2360_p13 }
  0x45   : > { %2368 = shalt.err (!%p2365_p2)
}
  0x46   : > { %s2369_s30 = scalar_lea.vmem %s2615_s9, 512  ;;  %p2377_p4 = scmp.lt.s32.totalorder %s2615_s9, %s2615_s9 }
  0x47   : > { %p2370_p5 = scmp.ne.s32.totalorder %s2615_s9, %s2369_s30  ;;  %p2378_p10 = scmp.lt.s32.totalorder %s2369_s30, %s2369_s30 }
  0x49   : > { %p2372_p7 = pnand %p2370_p5, %p2625_p8  ;;  %p2379_p11 = por %p2378_p10, %p2377_p4 }
  0x4b   : > { %p2373_p9 = pneg %p2372_p7 }
  0x4d   : > { %p2380_p12 = pnand %p2379_p11, %p2373_p9 }
  0x4f   : > { %2383 = shalt.err (!%p2380_p12)
}
  0x50   : > { %2210 = dma.hbm_to_vmem [thread:$0]  (!%p2609_p6), %s3038_s2, 512, %s2615_s9, [#allocation6], %s2521_s19, %s2521_s19, %s2522_s20  }
  0x51   : > { %s2523_s26 = smov [#allocation10]   ;;  %s2384_s29 = scalar_lea.hbm %s3040_s4, 512 }
  0x52   : > { %s237_s17 = sshll.u32 %s2523_s26, 4  ;;  %p2385_p13 = scmp.ne.s32.totalorder %s3040_s4, %s2384_s29  ;;  %s238_s17 = int_to_ptr.vmem [resolvable:$true] %s237_s17 }
  0x53   : > { %p2391_p5 = scmp.lt.u32.totalorder %s2384_s29, %s3040_s4 }
  0x54   : > { %p2387_p0 = pnand %p2385_p13, %p2625_p8 }
  0x56   : > { %p2388_p2 = pneg %p2387_p0 }
  0x58   : > { %p2393_p7 = pnand %p2391_p5, %p2388_p2 }
  0x5a   : > { %2396 = shalt.err (!%p2393_p7)
}
  0x5b   : > { %s2397_s9 = scalar_lea.vmem %s238_s17, 512  ;;  %p2405_p11 = scmp.lt.s32.totalorder %s238_s17, %s238_s17 }
  0x5c   : > { %p2398_p9 = scmp.ne.s32.totalorder %s238_s17, %s2397_s9  ;;  %p2406_p12 = scmp.lt.s32.totalorder %s2397_s9, %s2397_s9 }
  0x5e   : > { %p2400_p4 = pnand %p2398_p9, %p2625_p8  ;;  %p2407_p1 = por %p2406_p12, %p2405_p11 }
  0x60   : > { %p2401_p10 = pneg %p2400_p4 }
  0x62   : > { %p2408_p3 = pnand %p2407_p1, %p2401_p10 }
  0x64   : > { %2411 = shalt.err (!%p2408_p3)
}
  0x65   : > { %2216 = dma.hbm_to_vmem [thread:$0]  (!%p2609_p6), %s3040_s4, 512, %s238_s17, [#allocation9], %s2521_s19, %s2521_s19, %s2522_s20  }
  0x66   : > { %s1995_s7 = sadd.s32 4294967294, %s2516_s24   ;;  %s2724_s15 = sadd.s32 1, %s2516_s24  }
  0x67   : > { %s28_s14 = ssub.s32 %s2516_s24, %s2724_s15  ;;  %s31_s16 = sadd.s32 1, %s2512_s23 }
  0x68   : > { %p29_p1 = scmp.eq.s32.totalorder %s28_s14, 0  ;;  %p38_p3 = scmp.ne.s32.totalorder %s2512_s23, %s2508_s22 }
  0x69   : > { %p39_p8 = scmp.eq.s32.totalorder %s2516_s24, 0  ;;  %p44_p13 = scmp.ne.s32.totalorder %s2508_s22, %s2504_s21 }
  0x6a   : > { %s2735_s26 = scalar_select %p29_p1, %s2512_s23, %s31_s16  }
  0x6b   : > { %p2737_p0 = por %p39_p8, %p38_p3  ;;  %p3050_p2 = scmp.eq.s32.totalorder %s2593_s27, 0 }
  0x6c   : > { %p173_p5 = scmp.eq.s32.totalorder %s2593_s27, 1  ;;  %p179_p7 = scmp.eq.s32.totalorder %s1995_s7, 1 }
  0x6d   : > { %p2743_p6 = por %p3050_p2, %p44_p13  ;;  %p2229_p9 = scmp.lt.s32.totalorder %s2516_s24, 2 }
  0x6e   : > { %s254_s20 = sand.u32 1, %s2512_s23   ;;  %p2750_p4 = por %p173_p5, %p38_p3 }
  0x6f   : > { %p2754_p10 = por %p179_p7, %p44_p13  ;;  %s2002_s29 = sshll.u32 %s254_s20, 3 }
  0x70   : > { %s3052_s17 = scalar_select %p2750_p4, 1, 0 }
  0x71   : > { %s3053_s25 = scalar_select %p2754_p10, 1, 0 }
  0x72   : > { %s2003_s8 = sshll.u32 %s2516_s24, 7  ;;  %s258_s9 = scalar_lea.vmem [#allocation2], %s2002_s29 }
  0x73   : > { %s2762_s12 = scalar_lea.hbm %s3036_s0, %s2003_s8  ;;  %s265_s13 = sshll.u32 %s258_s9, 4  ;;  %s2764_s13 = int_to_ptr.vmem [resolvable:$true] %s265_s13 }
  0x74   : > { %p2768_p11 = pnand %p2229_p9, %p2737_p0  ;;  %s255_s7 = scalar_lea.sflag [#allocation3], %s254_s20 }
  0x75   : > { %s2412_s14 = scalar_lea.hbm %s2762_s12, 128  ;;  %s2417_s8 = scalar_lea.hbm %s3036_s0, 256 }
  0x76   : > { %p2413_p12 = scmp.ne.s32.totalorder %s2762_s12, %s2412_s14  ;;  %p2414_p1 = pneg %p2768_p11 }
  0x77   : > { %p2418_p13 = scmp.lt.u32.totalorder %s2762_s12, %s3036_s0  ;;  %p2419_p0 = scmp.lt.u32.totalorder %s2417_s8, %s2412_s14 }
  0x78   : > { %p2415_p3 = pnand %p2414_p1, %p2413_p12  ;;  %p2421_p5 = scmp.lt.u32.totalorder %s2412_s14, %s2762_s12 }
  0x79   : > { %p2420_p2 = por %p2419_p0, %p2418_p13 }
  0x7a   : > { %p2416_p8 = pneg %p2415_p3 }
  0x7b   : > { %p2422_p7 = por %p2421_p5, %p2420_p2 }
  0x7d   : > { %p2423_p9 = pnand %p2422_p7, %p2416_p8 }
  0x7f   : > { %2426 = shalt.err (!%p2423_p9)
}
  0x80   : > { %s2427_s20 = scalar_lea.vmem %s2764_s13, 128  ;;  %s2524_s11 = smov [#allocation2]  }
  0x81   : > { %p2428_p12 = scmp.ne.s32.totalorder %s2764_s13, %s2427_s20  ;;  %s2432_s9 = sshll.u32 %s2524_s11, 4  ;;  %s2433_s9 = int_to_ptr.vmem [resolvable:$false] %s2432_s9 }
  0x82   : > { %s2434_s16 = scalar_lea.vmem %s2433_s9, 256  ;;  %p2435_p4 = scmp.lt.s32.totalorder %s2764_s13, %s2433_s9 }
  0x83   : > { %p2430_p3 = pnand %p2428_p12, %p2414_p1  ;;  %p2436_p13 = scmp.lt.s32.totalorder %s2434_s16, %s2427_s20 }
  0x85   : > { %p2431_p10 = pneg %p2430_p3  ;;  %p2437_p0 = por %p2436_p13, %p2435_p4 }
  0x87   : > { %p2438_p2 = pnand %p2437_p0, %p2431_p10 }
  0x89   : > { %2441 = shalt.err (!%p2438_p2)
}
  0x8a   : > { %2220 = dma.hbm_to_vmem [thread:$0]  (!%p2768_p11), %s2762_s12, 128, %s2764_s13, %s255_s7  }
  0x8b   : > { %p3055_p8 = scmp.ne.s32.totalorder %s3046_s28, 0 }
  0x8c   : > { %s2800_s14 = sand.u32 (!%p3055_p8), 1, %s2508_s22  }
  0x8d   : > { %274 = sbr.rel (%p3055_p8) target bundleno = 1651 (0x673), region = 44  ;;  %s2005_s29 = sshll.u32 (!%p3055_p8), %s2800_s14, 3 }
  0x8e   : > { %s277_s8 = scalar_lea.sflag (!%p3055_p8), [#allocation3], %s2800_s14  ;;  %s2806_s18 = scalar_lea.vmem (!%p3055_p8), [#allocation2], %s2005_s29 }
  0x94   : > { %2487 = dma.done.wait (%p2743_p6), %s277_s8, 128  }
  0x95   : > { %2489 = vsyncadd (%p2743_p6), %s277_s8, 4294967168  ;;  %p3056_p4 = scmp.eq.s32.totalorder %s2593_s27, 0 }
  0x97   : > { %2491 = dma.done.wait (%p3056_p4), [#allocation6], 1024   ;;  %p3057_p10 = pmov %p3056_p4 }
  0x98   : > { %p3058_p11 = pmov %p3056_p4 }
  0x99   : > { %2493 = vsyncadd (%p3057_p10), [#allocation6], 4294966272 }
  0x9a   : > { %2495 = dma.done.wait (%p3058_p11), [#allocation9], 1024   ;;  %p3059_p1 = pmov %p3056_p4 }
  0x9b   : > { %v2525_v0 = vmov 0.0|0.0   ;;  %vm2526_vm0 = vmmov 0   ;;  %v2527_v1 = vmov 0.0   ;;  %v404_v2 = vld [vmem:[#allocation7] sm:$0xff]  ;;  %v405_v3 = vld [vmem:[#allocation7 + $0x8] sm:$0xff]  ;;  %v406_v7 = vld [vmem:[#allocation7 + $0x10] sm:$0xff]  ;;  %v567_v27 = vlaneseq }
  0x9c   : > { %2497 = vsyncadd (%p3059_p1), [#allocation9], 4294966272  ;;  %2166 = vmatprep.subr.bf16.mxu1 %v2525_v0  ;;  %2160 = vmatprep.subr.bf16.mxu0 %v2525_v0  ;;  %v326_v4 = vld [vmem:[#allocation5] sm:$0xff]  ;;  %v2167_v5 = vpack.c.bf16 %v405_v3, %v404_v2  ;;  %v327_v6 = vld [vmem:[#allocation5 + $0x8] sm:$0xff]  ;;  %vm330_vm1 = vcmask 261120   ;;  %s2528_s28 = smov 104  }
  0x9d   : > { %2095 = vmatprep.mubr.msk.f32.mxu1 %vm2526_vm0, %v2527_v1  ;;  %2084 = vmatprep.mubr.msk.f32.mxu0 %vm2526_vm0, %v2527_v1  ;;  %v407_v8 = vld [vmem:[#allocation7 + $0x18] sm:$0xff]  ;;  %v2161_v9 = vpack.c.bf16 %v327_v6, %v326_v4  ;;  %v328_v10 = vld [vmem:[#allocation5 + $0x10] sm:$0xff]  ;;  %s2529_s19 = smov 120   ;;  %s2530_s12 = smov 112   ;;  %v478_v19 = vld [vmem:[#allocation8] sm:$0xff]  ;;  %v568_v31 = vshrl.u32 %v567_v27, 7 }
  0x9e   : > { %v329_v11 = vld [vmem:[#allocation5 + $0x18] sm:$0xff]  ;;  %2168 = vmatpush3.bf16.msra.mxu1 %v2167_v5  ;;  %v2170_v12 = vpack.c.bf16 %v407_v8, %v406_v7  ;;  %v479_v20 = vld [vmem:[#allocation8 + $0x8] sm:$0xff]  ;;  %v480_v21 = vld [vmem:[#allocation8 + $0x10] sm:$0xff]  ;;  %v2531_v25 = vmov 1983009808   ;;  %vm990_vm2 = vcmask 64512  }
  0x9f   : > { %2162 = vmatpush3.bf16.msra.mxu0 %v2161_v9  ;;  %2169 = vmatprep.subr.bf16.mxu1 %v2525_v0  ;;  %v2164_v13 = vpack.c.bf16 %v329_v11, %v328_v10  ;;  %v325_v14 = vld [vmem:[%s2806_s18] sm:$0xff]  ;;  %v2173_v22 = vpack.c.bf16 %v479_v20, %v478_v19  ;;  %v565_v26 = vunpack.c.l.s4 %v2531_v25  ;;  %v2532_v28 = vmov 1934713408   ;;  %s2533_s13 = smov 16   ;;  %s2534_s30 = smov 8  }
  0xa0   : > { %2163 = vmatprep.subr.bf16.mxu0 %v2525_v0  ;;  %v481_v23 = vld [vmem:[#allocation8 + $0x18] sm:$0xff]  ;;  %v597_v29 = vunpack.c.l.s4 %v2532_v28  ;;  %s2535_s7 = smov 24   ;;  %vm1784_vm3 = vcmask 130048   ;;  %vm1786_vm4 = vcmask 195584   ;;  %s2037_s11 = sshll.u32 %s2593_s27, 7 }
  0xa1   : > { %v2176_v24 = vpack.c.bf16 %v481_v23, %v480_v21  ;;  %v566_v30 = vunpack.c.0.s8 %v565_v26  ;;  %s324_s9 = scalar_lea.vmem [#allocation11], %s2005_s29  ;;  %p3060_p5 = scmp.ne.s32.totalorder %s3052_s17, 0 }
  0xa2   : > { %2171 = vmatpush3.bf16.msra.mxu1 %v2170_v12  ;;  %v598_v34 = vunpack.c.0.s8 %v597_v29  ;;  %s1887_s16 = sshll.u32 %s324_s9, 4  ;;  %s2536_s29 = smov [#allocation11]   ;;  %s2993_s16 = int_to_ptr.vmem [resolvable:$true] %s1887_s16 }
  0xa3   : > { %2165 = vmatpush3.bf16.msra.mxu0 %v2164_v13  ;;  %2109 = vmatprep.subr.mxu1 %v2527_v1  ;;  %v2848_v35 = vsub.s32 %v566_v30, %v568_v31  ;;  %s2442_s27 = scalar_lea.vmem %s2993_s16, 128 }
  0xa4   : > { %2172 = vmatprep.subr.bf16.mxu0 %v2525_v0  ;;  %v2850_v42 = vsub.s32 %v598_v34, %v568_v31  ;;  %p2443_p6 = scmp.ne.s32.totalorder %s2993_s16, %s2442_s27 }
  0xa5   : > { %2096 = vmatmul.mubr.msk.f32.vlgmr.msra.gmra.mrb[0].mxu1 %vm330_vm1, %v325_v14 }
  0xa6   : > { %2085 = vmatmul.mubr.msk.f32.vlgmr.msra.gmra.mrb[0].mxu0 %vm330_vm1, %v325_v14  ;;  %2111 = vmatprep.mubr.msk.f32.mxu1 %vm2526_vm0, %v2527_v1  ;;  %p2444_p7 = pnand %p2443_p6, %p3060_p5 }
  0xa7   : > { %2106 = vmatprep.mubr.msk.f32.mxu0 %vm2526_vm0, %v2527_v1  ;;  %2174 = vmatpush3.bf16.msra.mxu0 %v2173_v22 }
  0xa8   : > { %2175 = vmatprep.subr.bf16.mxu0 %v2525_v0  ;;  %p2445_p9 = pneg %p2444_p7 }
  0xab   : > { %2177 = vmatpush3.bf16.msra.mxu0 %v2176_v24 }
  0xac   : > { %2129 = vmatprep.subr.mxu0 %v2527_v1 }
  0xae   : > { %2107 = vmatmul.mubr.msk.f32.vlgmr.msra.gmra.mrb[2].mxu0 %vm330_vm1, %v325_v14 }
  0xaf   : > { %2131 = vmatprep.mubr.msk.f32.mxu0 %vm2526_vm0, %v2527_v1 }
 0x178   : > { %v474_v15 = vpop.f32.mrb[0].mxu1 }
 0x179   : > { %705 = vrot.lane.b32.xlu1 %v474_v15, %s2528_s28  ;;  %699 = vrot.lane.b32.xlu0 %v474_v15, %s2529_s19  ;;  %v2097_v16 = vpop.f32.mrb[1].mxu1  ;;  %v400_v17 = vpop.f32.mrb[0].mxu0 }
 0x17a   : > { %v2086_v18 = vpop.f32.mrb[1].mxu0 }
 0x17d   : > { %702 = vrot.lane.b32.xlu0 %v474_v15, %s2530_s12  ;;  %553 = vrot.lane.b32.xlu1 %v400_v17, %s2529_s19 }
 0x181   : > { %556 = vrot.lane.b32.xlu0 %v400_v17, %s2530_s12  ;;  %559 = vrot.lane.b32.xlu1 %v400_v17, %s2528_s28 }
 0x1eb   : > { %v706_v32 = vpop.permute.xlu1 %705  ;;  %v700_v33 = vpop.permute.xlu0 %699 }
 0x1ec   : > { %v724_v36 = vcombine.low %v700_v33, %v706_v32  ;;  %v725_v37 = vcombine.high %v700_v33, %v706_v32 }
 0x1ee   : > { %v732_v43 = vrot.slane %v724_v36, %v2848_v35  ;;  %v739_v44 = vrot.slane %v725_v37, %v2848_v35 }
 0x1ef   : > { %v703_v38 = vpop.permute.xlu0 %702  ;;  %v554_v39 = vpop.permute.xlu1 %553 }
 0x1f0   : > { %v708_v40 = vcombine.low %v474_v15, %v703_v38  ;;  %v709_v41 = vcombine.high %v474_v15, %v703_v38 }
 0x1f2   : > { %v716_v45 = vrot.slane %v708_v40, %v2848_v35  ;;  %v723_v46 = vrot.slane %v709_v41, %v2848_v35 }
 0x1f3   : > { %v557_v47 = vpop.permute.xlu0 %556  ;;  %v560_v48 = vpop.permute.xlu1 %559 }
 0x1f4   : > { %v740_v49 = vcombine.low %v716_v45, %v732_v43  ;;  %v741_v50 = vcombine.high %v716_v45, %v732_v43  ;;  %v756_v51 = vcombine.low %v723_v46, %v739_v44  ;;  %v757_v52 = vcombine.high %v723_v46, %v739_v44 }
 0x1f5   : > { %v562_v53 = vcombine.low %v400_v17, %v557_v47  ;;  %v563_v54 = vcombine.high %v400_v17, %v557_v47  ;;  %v578_v55 = vcombine.low %v554_v39, %v560_v48  ;;  %v579_v56 = vcombine.high %v554_v39, %v560_v48 }
 0x1f6   : > { %v748_v57 = vrot.slane %v740_v49, %v2850_v42  ;;  %v755_v58 = vrot.slane %v741_v50, %v2850_v42  ;;  %v764_v59 = vrot.slane %v756_v51, %v2850_v42  ;;  %v771_v60 = vrot.slane %v757_v52, %v2850_v42 }
 0x1f7   : > { %v570_v61 = vrot.slane %v562_v53, %v2848_v35  ;;  %v577_v62 = vrot.slane %v563_v54, %v2848_v35  ;;  %v586_v63 = vrot.slane %v578_v55, %v2848_v35  ;;  %v593_v2 = vrot.slane %v579_v56, %v2848_v35  ;;  %v2904_v53 = vpop.f32.mrb[2].mxu0 }
 0x1f8   : > { %v776_v3 = vcombine.low %v748_v57, %v755_v58  ;;  %v2016_v4 = vcombine.high %v748_v57, %v755_v58  ;;  %v792_v5 = vcombine.low %v764_v59, %v771_v60  ;;  %v2017_v6 = vcombine.high %v764_v59, %v771_v60  ;;  %v2108_v54 = vpop.f32.mrb[3].mxu0 }
 0x1f9   : > { %v594_v7 = vcombine.low %v570_v61, %v586_v63  ;;  %v595_v8 = vcombine.high %v570_v61, %v586_v63  ;;  %v610_v9 = vcombine.low %v577_v62, %v593_v2  ;;  %v611_v10 = vcombine.high %v577_v62, %v593_v2 }
 0x1fa   : > { %v783_v11 = vrot.slane %v776_v3, %v2848_v35  ;;  %v791_v12 = vrot.slane %v2016_v4, %v2848_v35  ;;  %v799_v13 = vrot.slane %v792_v5, %v2848_v35  ;;  %v807_v14 = vrot.slane %v2017_v6, %v2848_v35 }
 0x1fb   : > { %v602_v15 = vrot.slane %v594_v7, %v2850_v42  ;;  %v609_v16 = vrot.slane %v595_v8, %v2850_v42  ;;  %v618_v17 = vrot.slane %v610_v9, %v2850_v42  ;;  %v625_v18 = vrot.slane %v611_v10, %v2850_v42 }
 0x1fc   : > { %v808_v19 = vcombine.low %v783_v11, %v791_v12  ;;  %v824_v20 = vcombine.low %v799_v13, %v807_v14  ;;  %v809_v34 = vcombine.high %v783_v11, %v791_v12  ;;  %v825_v36 = vcombine.high %v799_v13, %v807_v14 }
 0x1fd   : > { %v630_v21 = vcombine.low %v602_v15, %v609_v16  ;;  %v2014_v22 = vcombine.high %v602_v15, %v609_v16  ;;  %v646_v23 = vcombine.low %v618_v17, %v625_v18  ;;  %v2015_v24 = vcombine.high %v618_v17, %v625_v18 }
 0x1fe   : > { %v816_v25 = vrot.slane %v808_v19, %v2850_v42  ;;  %v832_v26 = vrot.slane %v824_v20, %v2850_v42  ;;  %v823_v44 = vrot.slane %v809_v34, %v2850_v42  ;;  %v839_v45 = vrot.slane %v825_v36, %v2850_v42 }
 0x1ff   : > { %v637_v27 = vrot.slane %v630_v21, %v2848_v35  ;;  %v645_v28 = vrot.slane %v2014_v22, %v2848_v35  ;;  %v653_v29 = vrot.slane %v646_v23, %v2848_v35  ;;  %v661_v30 = vrot.slane %v2015_v24, %v2848_v35 }
 0x200   : > { %v840_v31 = vcombine.low %v816_v25, %v832_v26  ;;  %v841_v43 = vcombine.high %v816_v25, %v832_v26  ;;  %v842_v49 = vcombine.low %v823_v44, %v839_v45  ;;  %v843_v51 = vcombine.high %v823_v44, %v839_v45 }
 0x201   : > { %v662_v32 = vcombine.low %v637_v27, %v645_v28  ;;  %v678_v33 = vcombine.low %v653_v29, %v661_v30  ;;  %v663_v39 = vcombine.high %v637_v27, %v645_v28  ;;  %v679_v40 = vcombine.high %v653_v29, %v661_v30 }
 0x202   : > { %2110 = vmatpush3.xpose.msk.msra.mxu1 %vm990_vm2, %v840_v31 }
 0x203   : > { %2114 = vmatprep.subr.mxu1 %v2527_v1  ;;  %v670_v37 = vrot.slane %v662_v32, %v2850_v42  ;;  %v686_v38 = vrot.slane %v678_v33, %v2850_v42  ;;  %v677_v47 = vrot.slane %v663_v39, %v2850_v42  ;;  %v693_v48 = vrot.slane %v679_v40, %v2850_v42 }
 0x205   : > { %v694_v41 = vcombine.low %v670_v37, %v686_v38  ;;  %v695_v46 = vcombine.high %v670_v37, %v686_v38  ;;  %v696_v50 = vcombine.low %v677_v47, %v693_v48  ;;  %v697_v52 = vcombine.high %v677_v47, %v693_v48 }
 0x207   : > { %2112 = vmatmul.mubr.msk.f32.vlgmr.msra.gmra.mrb[2].mxu1 %vm990_vm2, %v694_v41 }
 0x208   : > { %2115 = vmatpush3.xpose.msk.msra.mxu1 %vm990_vm2, %v841_v43  ;;  %2116 = vmatprep.mubr.msk.f32.mxu1 %vm2526_vm0, %v2527_v1 }
 0x209   : > { %2119 = vmatprep.subr.mxu1 %v2527_v1 }
 0x20b   : > { %2117 = vmatmul.mubr.msk.f32.vlgmr.msra.gmra.mrb[4].mxu1 %vm990_vm2, %v695_v46 }
 0x20c   : > { %2120 = vmatpush3.xpose.msk.msra.mxu1 %vm990_vm2, %v842_v49  ;;  %2121 = vmatprep.mubr.msk.f32.mxu1 %vm2526_vm0, %v2527_v1 }
 0x20d   : > { %2124 = vmatprep.subr.mxu1 %v2527_v1 }
 0x20f   : > { %2122 = vmatmul.mubr.msk.f32.vlgmr.msra.gmra.mrb[6].mxu1 %vm990_vm2, %v696_v50 }
 0x210   : > { %2125 = vmatpush3.xpose.msk.msra.mxu1 %vm990_vm2, %v843_v51  ;;  %2126 = vmatprep.mubr.msk.f32.mxu1 %vm2526_vm0, %v2527_v1 }
 0x211   : > { %2134 = vmatprep.subr.mxu1 %v2527_v1 }
 0x213   : > { %2127 = vmatmul.mubr.msk.f32.vlgmr.msra.gmra.mrb[8].mxu1 %vm990_vm2, %v697_v52 }
 0x214   : > { %2136 = vmatprep.mubr.msk.f32.mxu1 %vm2526_vm0, %v2527_v1 }
 0x2da   : > { %v1063_v55 = vpop.f32.mrb[2].mxu1 }
 0x2db   : > { %v1295_v56 = vmul.f32 0.35355338, %v1063_v55  ;;  %v2113_v57 = vpop.f32.mrb[3].mxu1 }
 0x2dd   : > { %v1299_v58 = vsel %vm990_vm2, %v1295_v56, -inf }
 0x2de   : > { %1300 = vmax.xlane.f32.xlu0 %v1299_v58  ;;  %v1139_v59 = vpop.f32.mrb[4].mxu1 }
 0x2df   : > { %v1296_v60 = vmul.f32 0.35355338, %v1139_v59  ;;  %v2118_v61 = vpop.f32.mrb[5].mxu1 }
 0x2e1   : > { %v1302_v62 = vsel %vm990_vm2, %v1296_v60, -inf }
 0x2e2   : > { %1303 = vmax.xlane.f32.xlu1 %v1302_v62  ;;  %v1215_v63 = vpop.f32.mrb[6].mxu1 }
 0x2e3   : > { %v1297_v2 = vmul.f32 0.35355338, %v1215_v63  ;;  %v2123_v3 = vpop.f32.mrb[7].mxu1 }
 0x2e5   : > { %v1305_v4 = vsel %vm990_vm2, %v1297_v2, -inf }
 0x2e6   : > { %1306 = vmax.xlane.f32.xlu0 %v1305_v4  ;;  %v1291_v5 = vpop.f32.mrb[8].mxu1 }
 0x2e7   : > { %v1298_v6 = vmul.f32 0.35355338, %v1291_v5  ;;  %v2128_v7 = vpop.f32.mrb[9].mxu1 }
 0x2e9   : > { %v1308_v8 = vsel %vm990_vm2, %v1298_v6, -inf }
 0x2ea   : > { %1309 = vmax.xlane.f32.xlu0 %v1308_v8 }
 0x2f3   : > { %845 = vrot.lane.b32.xlu1 %v2904_v53, %s2529_s19  ;;  %s1874_s19 = scalar_lea.sflag [#allocation4], %s2800_s14 }
 0x36b   : > { %v1301_v9 = vpop.xlane.xlu0 %1300 }
 0x36c   : > { %v1311_v10 = vsub.f32 %v1295_v56, %v1301_v9 }
 0x36e   : > { %v1315_v11 = vmul.f32 1.442695, %v1311_v10 }
 0x36f   : > { %v1304_v12 = vpop.xlane.xlu1 %1303 }
 0x370   : > { %2284 = vpow2.f32 %v1315_v11  ;;  %v1312_v13 = vsub.f32 %v1296_v60, %v1304_v12 }
 0x372   : > { %v1317_v14 = vmul.f32 1.442695, %v1312_v13 }
 0x373   : > { %v1307_v15 = vpop.xlane.xlu0 %1306  ;;  %v846_v29 = vpop.permute.xlu1 %845 }
 0x374   : > { %2286 = vpow2.f32 %v1317_v14  ;;  %v1313_v16 = vsub.f32 %v1297_v2, %v1307_v15 }
 0x376   : > { %v1319_v17 = vmul.f32 1.442695, %v1313_v16 }
 0x377   : > { %v1310_v18 = vpop.xlane.xlu0 %1309 }
 0x378   : > { %2288 = vpow2.f32 %v1319_v17  ;;  %v1314_v19 = vsub.f32 %v1298_v6, %v1310_v18 }
 0x37a   : > { %v2912_v20 = vpop.eup %2284  ;;  %v1321_v21 = vmul.f32 1.442695, %v1314_v19 }
 0x37b   : > { %v1323_v22 = vsel %vm990_vm2, %v2912_v20, 0.0 }
 0x37c   : > { %2290 = vpow2.f32 %v1321_v21  ;;  %1324 = vadd.xlane.f32.xlu1 %v1323_v22  ;;  %v1789_v21 = vld [vmem:[#allocation10 + $0x8] sm:$0xff] }
 0x37e   : > { %v2287_v23 = vpop.eup %2286 }
 0x37f   : > { %v1326_v24 = vsel %vm990_vm2, %v2287_v23, 0.0 }
 0x380   : > { %1327 = vadd.xlane.f32.xlu0 %v1326_v24 }
 0x382   : > { %v2917_v25 = vpop.eup %2288 }
 0x383   : > { %v1329_v26 = vsel %vm990_vm2, %v2917_v25, 0.0 }
 0x384   : > { %1330 = vadd.xlane.f32.xlu1 %v1329_v26 }
 0x386   : > { %v2921_v27 = vpop.eup %2290 }
 0x387   : > { %v1332_v28 = vsel %vm990_vm2, %v2921_v27, 0.0 }
 0x388   : > { %1333 = vadd.xlane.f32.xlu0 %v1332_v28 }
 0x395   : > { %851 = vrot.lane.b32.xlu1 %v2904_v53, %s2528_s28  ;;  %s2991_s28 = scalar_lea.hbm %s3042_s6, %s2037_s11 }
 0x39e   : > { %848 = vrot.lane.b32.xlu0 %v2904_v53, %s2530_s12  ;;  %s2446_s12 = sshll.u32 %s2536_s29, 4  ;;  %s2447_s12 = int_to_ptr.vmem [resolvable:$false] %s2446_s12 }
 0x39f   : > { %p2449_p12 = scmp.lt.s32.totalorder %s2993_s16, %s2447_s12 }
 0x409   : > { %v1325_v30 = vpop.xlane.xlu1 %1324 }
 0x40a   : > { %2292 = vrcp.f32 %v1325_v30 }
 0x40d   : > { %v1328_v31 = vpop.xlane.xlu0 %1327 }
 0x40e   : > { %2294 = vrcp.f32 %v1328_v31 }
 0x411   : > { %v1331_v32 = vpop.xlane.xlu1 %1330 }
 0x412   : > { %2296 = vrcp.f32 %v1331_v32 }
 0x414   : > { %v2293_v62 = vpop.eup %2292 }
 0x415   : > { %v1334_v33 = vpop.xlane.xlu0 %1333  ;;  %v852_v34 = vpop.permute.xlu1 %851  ;;  %v1336_v14 = vmul.f32 %v2293_v62, %v2912_v20  ;;  %v1788_v20 = vld [vmem:[#allocation10] sm:$0xff] }
 0x416   : > { %v870_v36 = vcombine.low %v846_v29, %v852_v34  ;;  %v871_v37 = vcombine.high %v846_v29, %v852_v34  ;;  %2298 = vrcp.f32 %v1334_v33  ;;  %v2179_v22 = vpack.c.bf16 %v1789_v21, %v1788_v20 }
 0x418   : > { %v878_v41 = vrot.slane %v870_v36, %v2848_v35  ;;  %v885_v43 = vrot.slane %v871_v37, %v2848_v35  ;;  %v2295_v5 = vpop.eup %2294 }
 0x419   : > { %v849_v38 = vpop.permute.xlu0 %848  ;;  %v1338_v15 = vmul.f32 %v2295_v5, %v2287_v23 }
 0x41a   : > { %v854_v39 = vcombine.low %v2904_v53, %v849_v38  ;;  %v855_v40 = vcombine.high %v2904_v53, %v849_v38 }
 0x41c   : > { %v862_v44 = vrot.slane %v854_v39, %v2848_v35  ;;  %v869_v45 = vrot.slane %v855_v40, %v2848_v35  ;;  %v2297_v8 = vpop.eup %2296 }
 0x41d   : > { %v1340_v18 = vmul.f32 %v2297_v8, %v2917_v25 }
 0x41e   : > { %v886_v46 = vcombine.low %v862_v44, %v878_v41  ;;  %v887_v47 = vcombine.high %v862_v44, %v878_v41  ;;  %v902_v48 = vcombine.low %v869_v45, %v885_v43  ;;  %v903_v49 = vcombine.high %v869_v45, %v885_v43  ;;  %v1790_v43 = vld [vmem:[#allocation10 + $0x10] sm:$0xff]  ;;  %v1791_v44 = vld [vmem:[#allocation10 + $0x18] sm:$0xff] }
 0x420   : > { %v894_v50 = vrot.slane %v886_v46, %v2850_v42  ;;  %v901_v51 = vrot.slane %v887_v47, %v2850_v42  ;;  %v910_v52 = vrot.slane %v902_v48, %v2850_v42  ;;  %v917_v53 = vrot.slane %v903_v49, %v2850_v42  ;;  %v2299_v13 = vpop.eup %2298 }
 0x421   : > { %v1342_v19 = vmul.f32 %v2299_v13, %v2921_v27  ;;  %v2182_v49 = vpack.c.bf16 %v1791_v44, %v1790_v43 }
 0x422   : > { %v922_v54 = vcombine.low %v894_v50, %v901_v51  ;;  %v2018_v55 = vcombine.high %v894_v50, %v901_v51  ;;  %v938_v56 = vcombine.low %v910_v52, %v917_v53  ;;  %v2019_v57 = vcombine.high %v910_v52, %v917_v53 }
 0x424   : > { %v929_v58 = vrot.slane %v922_v54, %v2848_v35  ;;  %v937_v59 = vrot.slane %v2018_v55, %v2848_v35  ;;  %v945_v60 = vrot.slane %v938_v56, %v2848_v35  ;;  %v953_v61 = vrot.slane %v2019_v57, %v2848_v35 }
 0x426   : > { %v954_v63 = vcombine.low %v929_v58, %v937_v59  ;;  %v970_v2 = vcombine.low %v945_v60, %v953_v61  ;;  %v955_v3 = vcombine.high %v929_v58, %v937_v59  ;;  %v971_v4 = vcombine.high %v945_v60, %v953_v61 }
 0x428   : > { %v962_v6 = vrot.slane %v954_v63, %v2850_v42  ;;  %v978_v7 = vrot.slane %v970_v2, %v2850_v42  ;;  %v969_v9 = vrot.slane %v955_v3, %v2850_v42  ;;  %v985_v10 = vrot.slane %v971_v4, %v2850_v42 }
 0x42a   : > { %v986_v11 = vcombine.low %v962_v6, %v978_v7  ;;  %v987_v12 = vcombine.high %v962_v6, %v978_v7  ;;  %v988_v16 = vcombine.low %v969_v9, %v985_v10  ;;  %v989_v17 = vcombine.high %v969_v9, %v985_v10 }
 0x42c   : > { %2130 = vmatpush3.msra.mxu0 %v986_v11  ;;  %2135 = vmatpush3.msra.mxu1 %v987_v12  ;;  %v2034_v12 = vld [vmem:[%s3041_s5] ss:$0 sm:$0xff] }
 0x42d   : > { %2132 = vmatmul.mubr.msk.f32.vlgmr.msra.gmra.mrb[4].mxu0 %vm990_vm2, %v1336_v14  ;;  %2137 = vmatmul.mubr.msk.f32.vlgmr.msra.gmra.mrb[10].mxu1 %vm990_vm2, %v1338_v15 }
 0x42e   : > { %2139 = vmatprep.subr.mxu0 %v2527_v1  ;;  %2144 = vmatprep.subr.mxu1 %v2527_v1 }
 0x42f   : > { %2140 = vmatpush3.msra.mxu0 %v988_v16  ;;  %2145 = vmatpush3.msra.mxu1 %v989_v17 }
 0x430   : > { %2141 = vmatprep.mubr.msk.f32.mxu0 %vm2526_vm0, %v2527_v1  ;;  %2146 = vmatprep.mubr.msk.f32.mxu1 %vm2526_vm0, %v2527_v1 }
 0x431   : > { %2142 = vmatmul.mubr.msk.f32.vlgmr.msra.gmra.mrb[6].mxu0 %vm990_vm2, %v1340_v18  ;;  %2147 = vmatmul.mubr.msk.f32.vlgmr.msra.gmra.mrb[12].mxu1 %vm990_vm2, %v1342_v19 }
 0x432   : > { %2178 = vmatprep.subr.bf16.mxu0 %v2525_v0  ;;  %2157 = vmatprep.mubr.msk.f32.mxu0 %vm2526_vm0, %v2527_v1 }
 0x433   : > { %2180 = vmatpush3.bf16.msra.mxu0 %v2179_v22 }
 0x434   : > { %2181 = vmatprep.subr.bf16.mxu0 %v2525_v0 }
 0x437   : > { %2183 = vmatpush3.bf16.msra.mxu0 %v2182_v49 }
 0x500   : > { %v1412_v23 = vpop.f32.mrb[4].mxu0  ;;  %v1485_v24 = vpop.f32.mrb[10].mxu1 }
 0x501   : > { %v2133_v25 = vpop.f32.mrb[5].mxu0  ;;  %v2138_v26 = vpop.f32.mrb[11].mxu1 }
 0x504   : > { %v1558_v27 = vpop.f32.mrb[6].mxu0  ;;  %v1631_v28 = vpop.f32.mrb[12].mxu1 }
 0x505   : > { %v1635_v29 = vcombine.low %v1412_v23, %v1558_v27  ;;  %v1636_v30 = vcombine.high %v1412_v23, %v1558_v27  ;;  %v1651_v31 = vcombine.low %v1485_v24, %v1631_v28  ;;  %v1652_v32 = vcombine.high %v1485_v24, %v1631_v28  ;;  %v2143_v33 = vpop.f32.mrb[7].mxu0  ;;  %v2148_v34 = vpop.f32.mrb[13].mxu1 }
 0x507   : > { %v1643_v1 = vrot.slane %v1635_v29, %v2848_v35  ;;  %v1650_v36 = vrot.slane %v1636_v30, %v2848_v35  ;;  %v1659_v37 = vrot.slane %v1651_v31, %v2848_v35  ;;  %v1666_v0 = vrot.slane %v1652_v32, %v2848_v35 }
 0x509   : > { %v1667_v38 = vcombine.low %v1643_v1, %v1659_v37  ;;  %v1668_v39 = vcombine.high %v1643_v1, %v1659_v37  ;;  %v1683_v40 = vcombine.low %v1650_v36, %v1666_v0  ;;  %v1684_v41 = vcombine.high %v1650_v36, %v1666_v0 }
 0x50b   : > { %v1675_v45 = vrot.slane %v1667_v38, %v2850_v42  ;;  %v1682_v46 = vrot.slane %v1668_v39, %v2850_v42  ;;  %v1691_v47 = vrot.slane %v1683_v40, %v2850_v42  ;;  %v1698_v48 = vrot.slane %v1684_v41, %v2850_v42 }
 0x50d   : > { %v1703_v50 = vcombine.low %v1675_v45, %v1682_v46  ;;  %v2032_v51 = vcombine.high %v1675_v45, %v1682_v46  ;;  %v1719_v52 = vcombine.low %v1691_v47, %v1698_v48  ;;  %v2033_v53 = vcombine.high %v1691_v47, %v1698_v48 }
 0x50f   : > { %v1710_v54 = vrot.slane %v1703_v50, %v2848_v35  ;;  %v1718_v55 = vrot.slane %v2032_v51, %v2848_v35  ;;  %v1726_v56 = vrot.slane %v1719_v52, %v2848_v35  ;;  %v1734_v57 = vrot.slane %v2033_v53, %v2848_v35 }
 0x511   : > { %v1736_v58 = vcombine.high %v1710_v54, %v1718_v55  ;;  %v1752_v59 = vcombine.high %v1726_v56, %v1734_v57  ;;  %v1735_v60 = vcombine.low %v1710_v54, %v1718_v55  ;;  %v1751_v61 = vcombine.low %v1726_v56, %v1734_v57 }
 0x513   : > { %v1750_v62 = vrot.slane %v1736_v58, %v2850_v42  ;;  %v1766_v63 = vrot.slane %v1752_v59, %v2850_v42  ;;  %v1743_v2 = vrot.slane %v1735_v60, %v2850_v42  ;;  %v1759_v3 = vrot.slane %v1751_v61, %v2850_v42 }
 0x515   : > { %v1769_v4 = vcombine.low %v1750_v62, %v1766_v63  ;;  %v1768_v5 = vcombine.high %v1743_v2, %v1759_v3  ;;  %v1770_v6 = vcombine.high %v1750_v62, %v1766_v63  ;;  %v1767_v7 = vcombine.low %v1743_v2, %v1759_v3 }
 0x517   : > { %1776 = vrot.lane.b32.xlu0 %v1769_v4, %s2533_s13  ;;  %1772 = vrot.lane.b32.xlu1 %v1768_v5, %s2534_s30  ;;  %s2448_s13 = scalar_lea.vmem %s2447_s12, 256 }
 0x518   : > { %p2450_p3 = scmp.lt.s32.totalorder %s2448_s13, %s2442_s27 }
 0x51a   : > { %p2451_p13 = por %p2450_p3, %p2449_p12 }
 0x51b   : > { %1780 = vrot.lane.b32.xlu1 %v1770_v6, %s2535_s7 }
 0x51c   : > { %p2452_p0 = pnand %p2451_p13, %p2445_p9 }
 0x589   : > { %v1773_v35 = vpop.permute.xlu1 %1772  ;;  %v1777_v8 = vpop.permute.xlu0 %1776 }
 0x58a   : > { %v1783_v9 = vsel %vm990_vm2, %v1767_v7, %v1773_v35 }
 0x58b   : > { %v1785_v10 = vsel %vm1784_vm3, %v1783_v9, %v1777_v8 }
 0x58d   : > { %v1781_v42 = vpop.permute.xlu1 %1780 }
 0x58e   : > { %v1787_v11 = vsel %vm1786_vm4, %v1785_v10, %v1781_v42 }
 0x58f   : > { %2158 = vmatmul.mubr.msk.f32.vlgmr.msra.gmra.mrb[8].mxu0 %vm330_vm1, %v1787_v11 }
 0x662   : > { %v1868_v13 = vpop.f32.mrb[8].mxu0 }
 0x663   : > { %v1869_v14 = vadd.f32 %v2034_v12, %v1868_v13  ;;  %v2159_v15 = vpop.f32.mrb[9].mxu0 }
 0x665   : > { %1872 = vst.msk [vmem:[%s324_s9] sm:$0xff] %vm330_vm1, %v1869_v14 }
 0x666   : > { %2455 = shalt.err (!%p2452_p0)
}
 0x667   : > { %s2456_s14 = scalar_lea.hbm %s2991_s28, 128  ;;  %s2460_s10 = scalar_lea.hbm %s3042_s6, 256 }
 0x668   : > { %p2457_p2 = scmp.ne.s32.totalorder %s2991_s28, %s2456_s14  ;;  %p2461_p10 = scmp.lt.u32.totalorder %s2991_s28, %s3042_s6 }
 0x669   : > { %p2462_p11 = scmp.lt.u32.totalorder %s2460_s10, %s2456_s14  ;;  %p2464_p6 = scmp.lt.u32.totalorder %s2456_s14, %s2991_s28 }
 0x66a   : > { %p2458_p8 = pnand %p2457_p2, %p3060_p5 }
 0x66b   : > { %p2463_p1 = por %p2462_p11, %p2461_p10 }
 0x66c   : > { %p2459_p4 = pneg %p2458_p8 }
 0x66d   : > { %p2465_p7 = por %p2464_p6, %p2463_p1 }
 0x66f   : > { %p2466_p9 = pnand %p2465_p7, %p2459_p4 }
 0x671   : > { %2469 = shalt.err (!%p2466_p9)
}
 0x672   : > { %2202 = dma.vmem_to_hbm [thread:$0]  (%p3060_p5), %s2993_s16, 128, %s2991_s28, %s1874_s19  }
 0x673 PF: > { %s1899_s9 = sand.u32 1, %s2504_s21   ;;  %p3061_p12 = scmp.ne.s32.totalorder %s3053_s25, 0 }
 0x674   : > { %p3062_p3 = scmp.ge.s32.totalorder %s2516_s24, 2  ;;  %s1900_s8 = scalar_lea.sflag [#allocation4], %s1899_s9 }
 0x676   : > { %p2222_p13 = pnand %p3062_p3, %p3061_p12 }
 0x678   : > { %2499 = dma.done.wait (!%p2222_p13), %s1900_s8, 128  }
 0x679   : > { %2501 = vsyncadd (!%p2222_p13), %s1900_s8, 4294967168  ;;  %p21_p0 = scmp.ge.s32.totalorder %s2724_s15, 4   ;;  %s3063_s21 = smov %s2508_s22 }
 0x67a   : > { %s3064_s22 = smov %s2512_s23  ;;  %s3065_s23 = smov %s2735_s26 }
 0x67b   : > { %s3066_s24 = smov %s2724_s15  ;;  %23 = sbr.rel (!%p21_p0) target bundleno = 7 (0x7), region = 105 }
 0x682   :  { %1905 = vsyncpa [#allocation3], 1 }
 0x683   :  { %1907 = vsyncpa [#allocation3 + $0x1], 1 }
 0x684   :  { %1908 = vsyncpa [#allocation6], 1 }
 0x685   :  { %1909 = vsyncpa [#allocation9], 1 }
 0x686   :  { %1910 = vsyncpa [#allocation4], 1 }
 0x687   :  { %1912 = vsyncpa [#allocation4 + $0x1], 1 }

</bundles_post_ra>
